<compile_context>
chip_gen: v5e
topology: v5e:2x2
jax: 0.10.0
libtpu: 0.0.40
codegen_flags: <defaults>
</compile_context>

<pallas_src>
import functools

import jax
import jax.numpy as jnp
from jax.experimental import pallas as pl
from jax.experimental.pallas import tpu as pltpu


def _round_up(x, m):
    return ((x + m - 1) // m) * m


def _multi_layer_gru_kernel(hidden_size,
                            x_ref, h0_ref, wih_ref, whh_ref, bih_ref, bhh_ref,
                            out_ref, carry_ref):
    """One grid step == one GRU layer.

    x_ref    : (B, K)     layer-0 input, zero-padded on lanes [I:K], param dtype
    h0_ref   : (1, B, H)  previous hidden state of this layer
    wih_ref  : (1, K, G)  input->hidden weights (gates r|z|n packed contiguously)
    whh_ref  : (1, H, G)  hidden->hidden weights
    bih_ref  : (1, 1, G)  input bias  (f32)
    bhh_ref  : (1, 1, G)  hidden bias (f32)
    out_ref  : (1, B, H)  new hidden state of this layer
    carry_ref: (B, K)     running input for the next layer (VMEM scratch)
    """
    H = hidden_size
    l = pl.program_id(0)
    last = pl.num_programs(0) - 1
    w_dtype = whh_ref.dtype

    @pl.when(l == 0)
    def _():
        carry_ref[...] = x_ref[...]

    inp = carry_ref[...]                       # (B, K), param dtype -> MXU path
    h_prev = h0_ref[0]                         # (B, H), states dtype

    # Two MXU matmuls per layer, f32 accumulation.
    gi = jnp.dot(inp, wih_ref[0], preferred_element_type=jnp.float32)
    gi = gi + bih_ref[0].astype(jnp.float32)
    gh = jnp.dot(h_prev.astype(w_dtype), whh_ref[0],
                 preferred_element_type=jnp.float32)
    gh = gh + bhh_ref[0].astype(jnp.float32)

    # Gate slots are packed contiguously: offsets 0, H, 2H inside the G lanes.
    r = jax.nn.sigmoid(gi[:, 0:H] + gh[:, 0:H])
    z = jax.nn.sigmoid(gi[:, H:2 * H] + gh[:, H:2 * H])
    n = jnp.tanh(gi[:, 2 * H:3 * H] + r * gh[:, 2 * H:3 * H])
    h_new = (1.0 - z) * n + z * h_prev.astype(jnp.float32)   # (B, H) f32

    out_ref[0] = h_new.astype(out_ref.dtype)

    # Next layer's input (eval-mode dropout == identity).
    # TODO(synk): training-mode dropout (pltpu.prng_seed / prng_random_bits) here.
    @pl.when(l < last)
    def _():
        h_c = h_new.astype(carry_ref.dtype)
        if carry_ref.shape[1] == H:
            carry_ref[...] = h_c
        else:
            # Lanes [H:K] multiply zero-padded weight rows in the next layer,
            # so their (stale) contents are mathematically irrelevant.
            carry_ref[:, 0:H] = h_c


def pack_params(params, input_size, hidden_size, param_dtype=None):
    """One-time transform: stack per-layer GRU weights into the uniform,
    zero-padded layout the layer-grid kernel expects.

    Logical per-layer params: (w_ih (in,3H), w_hh (H,3H), b_ih (1,3H), b_hh (1,3H)),
    gate order (r, z, n) like torch.nn.GRUCell.

    Returns (wih (L,K,G), whh (L,H,G), bih (L,1,G) f32, bhh (L,1,G) f32) where
    K = round_up(max(input_size, H), 8) and G = round_up(3H, 128).
    """
    H = hidden_size
    G = _round_up(3 * H, 128)
    K = _round_up(max(input_size, H), 8)
    if param_dtype is None:
        param_dtype = params[0][0].dtype

    wih, whh, bih, bhh = [], [], [], []
    for (w_ih, w_hh, b_ih, b_hh) in params:
        in_feat = w_ih.shape[0]
        wih.append(jnp.pad(w_ih, ((0, K - in_feat), (0, G - 3 * H))))
        whh.append(jnp.pad(w_hh, ((0, 0), (0, G - 3 * H))))
        bih.append(jnp.pad(b_ih, ((0, 0), (0, G - 3 * H))))
        bhh.append(jnp.pad(b_hh, ((0, 0), (0, G - 3 * H))))

    wih = jnp.stack(wih).astype(param_dtype)         # (L, K, G)
    whh = jnp.stack(whh).astype(param_dtype)         # (L, H, G)
    bih = jnp.stack(bih).astype(jnp.float32)         # (L, 1, G)  keep f32
    bhh = jnp.stack(bhh).astype(jnp.float32)         # (L, 1, G)  keep f32
    return wih, whh, bih, bhh


def multi_layer_gru_cell(x, states, kernel_params, dropout=0.0, training=False):
    """JAX/Pallas equivalent of MultiLayerGRUCell.forward (eval mode).

    x             : (B, input_size)
    states        : (num_layers, B, hidden_size)
    kernel_params : output of pack_params()
    Returns       : (num_layers, B, hidden_size)
    """
    if training and dropout > 0.0:
        raise NotImplementedError(
            "training-mode inter-layer dropout is not implemented in the kernel")

    L, B, H = states.shape
    wih, whh, bih, bhh = kernel_params
    _, K, G = wih.shape
    param_dtype = wih.dtype
    w_itemsize = jnp.dtype(param_dtype).itemsize
    s_itemsize = jnp.dtype(states.dtype).itemsize

    # Zero-pad x to the unified contraction width K and cast to the param dtype
    # so the MXU takes the (possibly bf16) fast path.
    x_p = x.astype(param_dtype)
    if x.shape[1] != K:
        x_p = jnp.pad(x_p, ((0, 0), (0, K - x.shape[1])))

    # VMEM budget: double-buffered per-layer weight/bias tiles + x + per-layer
    # h0/out blocks + the carry scratch + f32 gi/gh temporaries + slack.
    footprint = (2 * (K * G + H * G) * w_itemsize       # weights (x2 buffers)
                 + 2 * 2 * G * 4                          # biases  (x2 buffers)
                 + 2 * B * K * w_itemsize                 # x block
                 + 2 * 2 * B * H * s_itemsize             # h0 + out blocks
                 + B * K * w_itemsize                     # carry scratch
                 + 4 * B * G * 4                          # gi/gh + epilogue temps
                 + (4 << 20))                             # headroom
    # Cap at 64 MiB so the request also fits v7x's physical VMEM per TC.
    vmem_limit = int(min(max(footprint, 32 << 20), 64 << 20))

    cost = pl.CostEstimate(
        flops=int(2 * B * (K + H) * G * L),
        transcendentals=int(3 * B * H * L),
        bytes_accessed=int((wih.size + whh.size) * w_itemsize
                           + (bih.size + bhh.size) * 4
                           + x_p.size * w_itemsize
                           + 2 * states.size * s_itemsize),
    )

    kernel = functools.partial(_multi_layer_gru_kernel, H)

    return pl.pallas_call(
        kernel,
        out_shape=jax.ShapeDtypeStruct((L, B, H), states.dtype),
        grid=(L,),
        in_specs=[
            pl.BlockSpec((B, K), lambda l: (0, 0)),        # x (fetched once)
            pl.BlockSpec((1, B, H), lambda l: (l, 0, 0)),  # h0[l]
            pl.BlockSpec((1, K, G), lambda l: (l, 0, 0)),  # w_ih[l]
            pl.BlockSpec((1, H, G), lambda l: (l, 0, 0)),  # w_hh[l]
            pl.BlockSpec((1, 1, G), lambda l: (l, 0, 0)),  # b_ih[l]
            pl.BlockSpec((1, 1, G), lambda l: (l, 0, 0)),  # b_hh[l]
        ],
        out_specs=pl.BlockSpec((1, B, H), lambda l: (l, 0, 0)),
        scratch_shapes=[pltpu.VMEM((B, K), param_dtype)],   # running layer input
        compiler_params=pltpu.CompilerParams(
            dimension_semantics=("arbitrary",),             # carry across layers
            vmem_limit_bytes=vmem_limit),
        cost_estimate=cost,
    )(x_p, states, wih, whh, bih, bhh)


def init_params(key, input_size, hidden_size, num_layers, dtype=jnp.float32):
    """Deterministic init matching nn.GRUCell: U(-1/sqrt(H), 1/sqrt(H)).

    Per-layer logical params: w_ih (in_feat, 3H), w_hh (H, 3H), b_ih/b_hh (1, 3H),
    gate order (r, z, n).
    """
    params = []
    bound = 1.0 / (hidden_size ** 0.5)
    in_feat = input_size
    for _ in range(num_layers):
        key, k1, k2, k3, k4 = jax.random.split(key, 5)
        w_ih = jax.random.uniform(k1, (in_feat, 3 * hidden_size), dtype, -bound, bound)
        w_hh = jax.random.uniform(k2, (hidden_size, 3 * hidden_size), dtype, -bound, bound)
        b_ih = jax.random.uniform(k3, (1, 3 * hidden_size), dtype, -bound, bound)
        b_hh = jax.random.uniform(k4, (1, 3 * hidden_size), dtype, -bound, bound)
        params.append((w_ih, w_hh, b_ih, b_hh))
        in_feat = hidden_size
    return params


def _reference_forward(x, states, params):
    """Pure-JAX reference (matches torch.nn.GRUCell math, eval mode)."""
    H = states.shape[-1]
    outs = []
    inp = x
    for i, (w_ih, w_hh, b_ih, b_hh) in enumerate(params):
        h = states[i]
        gi = inp @ w_ih + b_ih
        gh = h @ w_hh + b_hh
        r = jax.nn.sigmoid(gi[:, :H] + gh[:, :H])
        z = jax.nn.sigmoid(gi[:, H:2 * H] + gh[:, H:2 * H])
        n = jnp.tanh(gi[:, 2 * H:] + r * gh[:, 2 * H:])
        h_new = (1.0 - z) * n + z * h
        outs.append(h_new)
        inp = h_new
    return jnp.stack(outs, axis=0)


if __name__ == "__main__":
    batch = 8
    input_size = 32
    hidden_size = 32
    num_layers = 3
    dropout = 0.1  # identity in eval mode

    key = jax.random.PRNGKey(0)
    kx, kh, kp = jax.random.split(key, 3)

    x = jax.random.normal(kx, (batch, input_size), jnp.float32)
    states = jax.random.normal(kh, (num_layers, batch, hidden_size), jnp.float32)
    params = init_params(kp, input_size, hidden_size, num_layers)

    fwd = jax.jit(functools.partial(multi_layer_gru_cell,
                                    dropout=dropout, training=False))
    ref = _reference_forward(x, states, params)

    # f32 weights: exact-ish check against the pure-JAX reference.
    kparams_f32 = pack_params(params, input_size, hidden_size)
    out_f32 = jax.block_until_ready(fwd(x, states, kparams_f32))
    assert out_f32.shape == (num_layers, batch, hidden_size)
    assert jnp.allclose(out_f32, ref, atol=1e-5, rtol=1e-5)

    # bf16 weights (bandwidth-optimized storage): loose check.
    kparams_bf16 = pack_params(params, input_size, hidden_size,
                               param_dtype=jnp.bfloat16)
    out_bf16 = jax.block_until_ready(fwd(x, states, kparams_bf16))
    assert out_bf16.shape == (num_layers, batch, hidden_size)
    assert bool(jnp.all(jnp.isfinite(out_bf16)))
    assert jnp.allclose(out_bf16, ref, atol=5e-2, rtol=5e-2)

    print("KERNEL_OK")
</pallas_src>

<mosaic_0001>
module attributes {stable_mosaic.version = 11 : i64} {
  func.func @_multi_layer_gru_kernel(%arg0: i32, %arg1: memref<8x32xf32, #tpu.memory_space<vmem>>, %arg2: memref<1x8x32xf32, #tpu.memory_space<vmem>>, %arg3: memref<1x32x128xf32, #tpu.memory_space<vmem>>, %arg4: memref<1x32x128xf32, #tpu.memory_space<vmem>>, %arg5: memref<1x1x128xf32, #tpu.memory_space<vmem>>, %arg6: memref<1x1x128xf32, #tpu.memory_space<vmem>>, %arg7: memref<1x8x32xf32, #tpu.memory_space<vmem>>, %arg8: memref<8x32xf32, #tpu.memory_space<vmem>>) attributes {dimension_semantics = [#tpu.dimension_semantics<arbitrary>], iteration_bounds = array<i64: 3>, scalar_prefetch = 0 : i64, scratch_operands = 1 : i64, tpu.core_type = #tpu.core_type<tc>, window_params = [{pipeline_mode = #tpu.pipeline_mode<synchronous>, transform_indices = @transform_0, window_bounds = array<i64: 8, 32>}, {transform_indices = @transform_1, window_bounds = array<i64: 1, 8, 32>}, {transform_indices = @transform_2, window_bounds = array<i64: 1, 32, 128>}, {transform_indices = @transform_3, window_bounds = array<i64: 1, 32, 128>}, {transform_indices = @transform_4, window_bounds = array<i64: 1, 1, 128>}, {transform_indices = @transform_5, window_bounds = array<i64: 1, 1, 128>}, {transform_indices = @transform_6, window_bounds = array<i64: 1, 8, 32>}]} {
    %c0_i32 = arith.constant 0 : i32
    %0 = arith.cmpi eq, %arg0, %c0_i32 : i32
    %1 = arith.extui %0 : i1 to i32
    %c0_i32_0 = arith.constant 0 : i32
    %2 = arith.cmpi ne, %1, %c0_i32_0 : i32
    scf.if %2 {
      %c0_25 = arith.constant 0 : index
      %c0_26 = arith.constant 0 : index
      %52 = vector.load %arg1[%c0_25, %c0_26] : memref<8x32xf32, #tpu.memory_space<vmem>>, vector<8x32xf32>
      %c0_27 = arith.constant 0 : index
      %c0_28 = arith.constant 0 : index
      %53 = vector.load %arg8[%c0_27, %c0_28] : memref<8x32xf32, #tpu.memory_space<vmem>>, vector<8x32xf32>
      tpu.vector_store %arg8[%c0_27, %c0_28], %52 {strides = array<i32>} : memref<8x32xf32, #tpu.memory_space<vmem>>, vector<8x32xf32>,
    } else {
    }
    %c0 = arith.constant 0 : index
    %c0_1 = arith.constant 0 : index
    %3 = vector.load %arg8[%c0, %c0_1] : memref<8x32xf32, #tpu.memory_space<vmem>>, vector<8x32xf32>
    %c0_2 = arith.constant 0 : index
    %c0_3 = arith.constant 0 : index
    %c0_4 = arith.constant 0 : index
    %4 = vector.load %arg2[%c0_2, %c0_3, %c0_4] : memref<1x8x32xf32, #tpu.memory_space<vmem>>, vector<1x8x32xf32>
    %5 = vector.shape_cast %4 : vector<1x8x32xf32> to vector<8x32xf32>
    %c0_5 = arith.constant 0 : index
    %c0_6 = arith.constant 0 : index
    %c0_7 = arith.constant 0 : index
    %6 = vector.load %arg3[%c0_5, %c0_6, %c0_7] : memref<1x32x128xf32, #tpu.memory_space<vmem>>, vector<1x32x128xf32>
    %7 = vector.shape_cast %6 : vector<1x32x128xf32> to vector<32x128xf32>
    %cst = arith.constant dense<0.000000e+00> : vector<8x128xf32>
    %8 = tpu.matmul %3, %7, %cst {dimension_numbers = #tpu.dot_dimension_numbers<[1], [0], [0], [1], [0, 0, 1, 1], [], []>} : vector<8x32xf32>, vector<32x128xf32>, vector<8x128xf32> -> vector<8x128xf32>
    %c0_8 = arith.constant 0 : index
    %c0_9 = arith.constant 0 : index
    %c0_10 = arith.constant 0 : index
    %9 = vector.load %arg5[%c0_8, %c0_9, %c0_10] : memref<1x1x128xf32, #tpu.memory_space<vmem>>, vector<1x1x128xf32>
    %10 = vector.shape_cast %9 : vector<1x1x128xf32> to vector<1x128xf32>
    %11 = vector.broadcast %10 : vector<1x128xf32> to vector<8x128xf32>
    %12 = arith.addf %8, %11 : vector<8x128xf32>
    %c0_11 = arith.constant 0 : index
    %c0_12 = arith.constant 0 : index
    %c0_13 = arith.constant 0 : index
    %13 = vector.load %arg4[%c0_11, %c0_12, %c0_13] : memref<1x32x128xf32, #tpu.memory_space<vmem>>, vector<1x32x128xf32>
    %14 = vector.shape_cast %13 : vector<1x32x128xf32> to vector<32x128xf32>
    %cst_14 = arith.constant dense<0.000000e+00> : vector<8x128xf32>
    %15 = tpu.matmul %5, %14, %cst_14 {dimension_numbers = #tpu.dot_dimension_numbers<[1], [0], [0], [1], [0, 0, 1, 1], [], []>} : vector<8x32xf32>, vector<32x128xf32>, vector<8x128xf32> -> vector<8x128xf32>
    %c0_15 = arith.constant 0 : index
    %c0_16 = arith.constant 0 : index
    %c0_17 = arith.constant 0 : index
    %16 = vector.load %arg6[%c0_15, %c0_16, %c0_17] : memref<1x1x128xf32, #tpu.memory_space<vmem>>, vector<1x1x128xf32>
    %17 = vector.shape_cast %16 : vector<1x1x128xf32> to vector<1x128xf32>
    %18 = vector.broadcast %17 : vector<1x128xf32> to vector<8x128xf32>
    %19 = arith.addf %15, %18 : vector<8x128xf32>
    %20 = vector.extract_strided_slice %12 {offsets = [0, 0], sizes = [8, 32], strides = [1, 1]} : vector<8x128xf32> to vector<8x32xf32>
    %21 = vector.extract_strided_slice %19 {offsets = [0, 0], sizes = [8, 32], strides = [1, 1]} : vector<8x128xf32> to vector<8x32xf32>
    %22 = arith.addf %20, %21 : vector<8x32xf32>
    %23 = arith.negf %22 : vector<8x32xf32>
    %24 = math.exp %23 : vector<8x32xf32>
    %cst_18 = arith.constant 1.000000e+00 : f32
    %25 = vector.broadcast %cst_18 : f32 to vector<8x32xf32>
    %26 = arith.addf %25, %24 : vector<8x32xf32>
    %27 = arith.divf %25, %26 : vector<8x32xf32>
    %28 = vector.extract_strided_slice %12 {offsets = [0, 32], sizes = [8, 32], strides = [1, 1]} : vector<8x128xf32> to vector<8x32xf32>
    %29 = vector.extract_strided_slice %19 {offsets = [0, 32], sizes = [8, 32], strides = [1, 1]} : vector<8x128xf32> to vector<8x32xf32>
    %30 = arith.addf %28, %29 : vector<8x32xf32>
    %31 = arith.negf %30 : vector<8x32xf32>
    %32 = math.exp %31 : vector<8x32xf32>
    %cst_19 = arith.constant 1.000000e+00 : f32
    %33 = vector.broadcast %cst_19 : f32 to vector<8x32xf32>
    %34 = arith.addf %33, %32 : vector<8x32xf32>
    %35 = arith.divf %33, %34 : vector<8x32xf32>
    %36 = vector.extract_strided_slice %12 {offsets = [0, 64], sizes = [8, 32], strides = [1, 1]} : vector<8x128xf32> to vector<8x32xf32>
    %37 = vector.extract_strided_slice %19 {offsets = [0, 64], sizes = [8, 32], strides = [1, 1]} : vector<8x128xf32> to vector<8x32xf32>
    %38 = arith.mulf %27, %37 : vector<8x32xf32>
    %39 = arith.addf %36, %38 : vector<8x32xf32>
    %40 = math.tanh %39 : vector<8x32xf32>
    %cst_20 = arith.constant 1.000000e+00 : f32
    %41 = vector.broadcast %cst_20 : f32 to vector<8x32xf32>
    %42 = arith.subf %41, %35 : vector<8x32xf32>
    %43 = arith.mulf %42, %40 : vector<8x32xf32>
    %44 = arith.mulf %35, %5 : vector<8x32xf32>
    %45 = arith.addf %43, %44 : vector<8x32xf32>
    %c0_21 = arith.constant 0 : index
    %c0_22 = arith.constant 0 : index
    %c0_23 = arith.constant 0 : index
    %46 = vector.load %arg7[%c0_21, %c0_22, %c0_23] : memref<1x8x32xf32, #tpu.memory_space<vmem>>, vector<1x8x32xf32>
    %47 = vector.shape_cast %46 : vector<1x8x32xf32> to vector<8x32xf32>
    %48 = vector.shape_cast %45 : vector<8x32xf32> to vector<1x8x32xf32>
    tpu.vector_store %arg7[%c0_21, %c0_22, %c0_23], %48 {strides = array<i32>} : memref<1x8x32xf32, #tpu.memory_space<vmem>>, vector<1x8x32xf32>,
    %c2_i32 = arith.constant 2 : i32
    %49 = arith.cmpi slt, %arg0, %c2_i32 : i32
    %50 = arith.extui %49 : i1 to i32
    %c0_i32_24 = arith.constant 0 : i32
    %51 = arith.cmpi ne, %50, %c0_i32_24 : i32
    scf.if %51 {
      %c0_25 = arith.constant 0 : index
      %c0_26 = arith.constant 0 : index
      %52 = vector.load %arg8[%c0_25, %c0_26] : memref<8x32xf32, #tpu.memory_space<vmem>>, vector<8x32xf32>
      tpu.vector_store %arg8[%c0_25, %c0_26], %45 {strides = array<i32>} : memref<8x32xf32, #tpu.memory_space<vmem>>, vector<8x32xf32>,
    } else {
    }
    return
  }
  func.func @transform_0(%arg0: i32) -> (i32, i32) {
    %c0_i32 = arith.constant 0 : i32
    %c0_i32_0 = arith.constant 0 : i32
    %c0_i32_1 = arith.constant 0 : i32
    return %c0_i32, %c0_i32_0 : i32, i32
  }
  func.func @transform_1(%arg0: i32) -> (i32, i32, i32) {
    %c0_i32 = arith.constant 0 : i32
    %c0_i32_0 = arith.constant 0 : i32
    %c0_i32_1 = arith.constant 0 : i32
    return %arg0, %c0_i32, %c0_i32_0 : i32, i32, i32
  }
  func.func @transform_2(%arg0: i32) -> (i32, i32, i32) {
    %c0_i32 = arith.constant 0 : i32
    %c0_i32_0 = arith.constant 0 : i32
    %c0_i32_1 = arith.constant 0 : i32
    return %arg0, %c0_i32, %c0_i32_0 : i32, i32, i32
  }
  func.func @transform_3(%arg0: i32) -> (i32, i32, i32) {
    %c0_i32 = arith.constant 0 : i32
    %c0_i32_0 = arith.constant 0 : i32
    %c0_i32_1 = arith.constant 0 : i32
    return %arg0, %c0_i32, %c0_i32_0 : i32, i32, i32
  }
  func.func @transform_4(%arg0: i32) -> (i32, i32, i32) {
    %c0_i32 = arith.constant 0 : i32
    %c0_i32_0 = arith.constant 0 : i32
    %c0_i32_1 = arith.constant 0 : i32
    return %arg0, %c0_i32, %c0_i32_0 : i32, i32, i32
  }
  func.func @transform_5(%arg0: i32) -> (i32, i32, i32) {
    %c0_i32 = arith.constant 0 : i32
    %c0_i32_0 = arith.constant 0 : i32
    %c0_i32_1 = arith.constant 0 : i32
    return %arg0, %c0_i32, %c0_i32_0 : i32, i32, i32
  }
  func.func @transform_6(%arg0: i32) -> (i32, i32, i32) {
    %c0_i32 = arith.constant 0 : i32
    %c0_i32_0 = arith.constant 0 : i32
    %c0_i32_1 = arith.constant 0 : i32
    return %arg0, %c0_i32, %c0_i32_0 : i32, i32, i32
  }
}

</mosaic_0001>

<bundles_post_ra>
// kernel: multi_layer_gru_cell.1
= control target key start
LH: loop header
LB: loop body
LE: loop exit
PB: predicated region body
PF: predicated region fallthrough
CT: control target
= control target key end

     0   :  { %s1345_s0 = inlined_call_operand.hbm [shape: f32[8,32], index: 0, kind: input, shape index: {}]   ;;  %s1346_s1 = inlined_call_operand.hbm [shape: f32[3,8,32], index: 1, kind: input, shape index: {}]   ;;  %s1347_s2 = inlined_call_operand.hbm [shape: f32[3,32,128], index: 2, kind: input, shape index: {}]   ;;  %s1348_s3 = inlined_call_operand.hbm [shape: f32[3,32,128], index: 3, kind: input, shape index: {}]   ;;  %s1349_s4 = inlined_call_operand.vmem [shape: f32[3,1,128], index: 4, kind: input, shape index: {}]   ;;  %s1350_s5 = inlined_call_operand.hbm [shape: f32[3,1,128], index: 5, kind: input, shape index: {}]   ;;  %s1351_s6 = inlined_call_operand.hbm [shape: f32[3,8,32], index: 6, kind: output, shape index: {}]  }
   0x1   :  { %1359 = sst [smem:[#allocation20_spill]] %s1345_s0 }
   0x2   :  { %1360 = sst [smem:[#allocation21_spill]] %s1346_s1 }
   0x3   :  { %1361 = sst [smem:[#allocation22_spill]] %s1347_s2 }
   0x4   :  { %1362 = sst [smem:[#allocation23_spill]] %s1348_s3 }
   0x5   :  { %11 = vsyncpa [#allocation4], 0 }
   0x6   :  { %12 = vsyncpa [#allocation7], 0 }
   0x7   :  { %14 = vsyncpa [#allocation7 + $0x1], 0 }
   0x8   :  { %15 = vsyncpa [#allocation10], 0 }
   0x9   :  { %17 = vsyncpa [#allocation10 + $0x1], 0 }
   0xa   :  { %18 = vsyncpa [#allocation5], 0 }
   0xb   :  { %20 = vsyncpa [#allocation5 + $0x1], 0  ;;  %s1082_s21 = smov 0   ;;  %s1084_s22 = smov 0  }
   0xc   :  { %s1086_s23 = smov 0   ;;  %s1088_s24 = smov 0  }
   0xd LB: > { %1363 = sst [smem:[#allocation17_spill]] %s1035_s23  ;;  %s1103_s25 = sadd.s32 1, %s1039_s24   ;;  %s1039_s24 = sphi %s1088_s24, %s1382_s24   ;;  %s1035_s23 = sphi %s1086_s23, %s1384_s23   ;;  %s1031_s22 = sphi %s1084_s22, %s1386_s22   ;;  %s1027_s21 = sphi %s1082_s21, %s1385_s21  }
   0xe   : > { %1364 = sst [smem:[#allocation18_spill]] %s1103_s25  ;;  %s54_s26 = sadd.s32 1, %s1035_s23 }
   0xf   : > { %s51_s27 = ssub.s32 %s1039_s24, %s1103_s25  ;;  %p61_p0 = scmp.ne.s32.totalorder %s1035_s23, %s1031_s22 }
  0x10   : > { %p52_p1 = scmp.eq.s32.totalorder %s51_s27, 0  ;;  %p62_p2 = scmp.eq.s32.totalorder %s1039_s24, 0 }
  0x11   : > { %p766_p3 = scmp.lt.s32.totalorder %s1039_s24, 3  ;;  %s1352_s29 = sand.u32 1, %s1039_s24  }
  0x12   : > { %s1113_s28 = scalar_select %p52_p1, %s1035_s23, %s54_s26  }
  0x13   : > { %p63_p4 = por %p62_p2, %p61_p0  ;;  %s1120_s30 = sand.u32 1, %s1035_s23  }
  0x14   : > { %1365 = sst [smem:[#allocation19_spill]] %s1113_s28  ;;  %s705_s7 = sshll.u32 %s1120_s30, 3 }
  0x15   : > { %s706_s8 = sshll.u32 %s1039_s24, 3  ;;  %s1366_s1 = sld [smem:[#allocation21_spill]] }
  0x16   : > { %s237_s13 = scalar_lea.vmem [#allocation6], %s705_s7  ;;  %p1129_p5 = pnand %p766_p3, %p63_p4 }
  0x17   : > { %s245_s14 = sshll.u32 %s237_s13, 4  ;;  %s707_s16 = sshll.u32 %s1120_s30, 5  ;;  %s246_s14 = int_to_ptr.vmem [resolvable:$true] %s245_s14 }
  0x18   : > { %s256_s17 = scalar_lea.vmem [#allocation8], %s707_s16  ;;  %s1136_s19 = scalar_lea.sflag [#allocation7], %s1352_s29 }
  0x19   : > { %s264_s18 = sshll.u32 %s256_s17, 4  ;;  %p819_p7 = pneg %p1129_p5  ;;  %s1152_s18 = int_to_ptr.vmem [resolvable:$true] %s264_s18 }
  0x1b   : > { %s241_s11 = scalar_lea.hbm %s1366_s1, %s706_s8  ;;  %s822_s8 = scalar_lea.hbm %s1366_s1, 24 }
  0x1c   : > { %s243_s12 = sshll.u32 %s241_s11, 4  ;;  %s244_s12 = int_to_ptr.hbm [resolvable:$true] %s243_s12 }
  0x1d   : > { %s815_s20 = sshra.s32 %s244_s12, 4  ;;  %s816_s20 = int_to_ptr.hbm [resolvable:$true] %s815_s20 }
  0x1e   : > { %s817_s26 = scalar_lea.hbm %s816_s20, 8  ;;  %p823_p10 = scmp.lt.s32.totalorder %s816_s20, %s1366_s1 }
  0x1f   : > { %p818_p6 = scmp.ne.s32.totalorder %s816_s20, %s817_s26  ;;  %p824_p11 = scmp.lt.s32.totalorder %s822_s8, %s817_s26 }
  0x21   : > { %p820_p8 = pnand %p819_p7, %p818_p6  ;;  %p825_p12 = por %p824_p11, %p823_p10 }
  0x23   : > { %p821_p9 = pneg %p820_p8 }
  0x25   : > { %p826_p13 = pnand %p825_p12, %p821_p9 }
  0x27   : > { %829 = shalt.err (!%p826_p13)
}
  0x28   : > { %751 = dma.hbm_to_vmem [thread:$0]  (!%p1129_p5), %s244_s12, 128, %s246_s14, %s1136_s19  }
  0x29   : > { %s728_s11 = sshll.u32 %s1039_s24, 5  ;;  %s1368_s2 = sld [smem:[#allocation22_spill]] }
  0x2a   : > { %s1369_s3 = sld [smem:[#allocation23_spill]]  ;;  %s278_s9 = scalar_lea.vmem [#allocation9], %s707_s16 }
  0x2b   : > { %s286_s10 = sshll.u32 %s278_s9, 4  ;;  %s1370_s12 = sand.u32 1, %s1039_s24   ;;  %s287_s10 = int_to_ptr.vmem [resolvable:$true] %s286_s10 }
  0x2c   : > { %s1165_s14 = scalar_lea.sflag [#allocation10], %s1370_s12 }
  0x2f   : > { %s261_s27 = scalar_lea.hbm %s1368_s2, %s728_s11 }
  0x30   : > { %s262_s7 = sshll.u32 %s261_s27, 4  ;;  %s283_s8 = scalar_lea.hbm %s1369_s3, %s728_s11  ;;  %s1158_s7 = int_to_ptr.hbm [resolvable:$true] %s262_s7 }
  0x31   : > { %s284_s29 = sshll.u32 %s283_s8, 4  ;;  %s852_s11 = scalar_lea.hbm %s1369_s3, 96  ;;  %s285_s29 = int_to_ptr.hbm [resolvable:$true] %s284_s29 }
  0x32   : > { %s845_s1 = sshra.s32 %s285_s29, 4  ;;  %s846_s1 = int_to_ptr.hbm [resolvable:$true] %s845_s1 }
  0x33   : > { %s847_s28 = scalar_lea.hbm %s846_s1, 32  ;;  %p853_p4 = scmp.lt.s32.totalorder %s846_s1, %s1369_s3 }
  0x34   : > { %p848_p1 = scmp.ne.s32.totalorder %s846_s1, %s847_s28  ;;  %p854_p6 = scmp.lt.s32.totalorder %s852_s11, %s847_s28 }
  0x36   : > { %p850_p2 = pnand %p848_p1, %p819_p7  ;;  %p855_p8 = por %p854_p6, %p853_p4 }
  0x38   : > { %p851_p3 = pneg %p850_p2 }
  0x3a   : > { %p856_p9 = pnand %p855_p8, %p851_p3 }
  0x3c   : > { %859 = shalt.err (!%p856_p9)
}
  0x3d   : > { %s1353_s20 = smov 128   ;;  %s1354_s26 = smov 8  }
  0x3e   : > { %757 = dma.hbm_to_vmem [thread:$0]  (!%p1129_p5), %s285_s29, 512, %s287_s10, %s1165_s14, %s1353_s20, %s1353_s20, %s1354_s26  }
  0x3f   : > { %s1183_s1 = sadd.s32 4294967295, %s1039_s24   ;;  %s701_s28 = sadd.s32 4294967294, %s1039_s24  }
  0x40   : > { %p67_p10 = scmp.ne.s32.totalorder %s1031_s22, %s1027_s21  ;;  %p1356_p11 = scmp.eq.s32.totalorder %s1183_s1, 0 }
  0x41   : > { %p195_p12 = scmp.eq.s32.totalorder %s1183_s1, 2  ;;  %p201_p13 = scmp.eq.s32.totalorder %s701_s28, 2 }
  0x42   : > { %p702_p1 = scmp.ge.s32.totalorder %s1039_s24, 1  ;;  %p1193_p2 = por %p1356_p11, %p67_p10 }
  0x43   : > { %p1200_p3 = por %p195_p12, %p61_p0  ;;  %p1204_p4 = por %p201_p13, %p67_p10 }
  0x44   : > { %p208_p6 = scmp.lt.s32.totalorder %s1039_s24, 4  ;;  %s1374_s0 = sld [smem:[#allocation20_spill]] }
  0x45   : > { %s1043_s11 = smov [#allocation3]   ;;  %s308_s20 = scalar_lea.hbm %s1350_s5, %s1039_s24 }
  0x46   : > { %p1213_p9 = pnand %p702_p1, %p208_p6  ;;  %s222_s16 = sshll.u32 %s1043_s11, 4  ;;  %s223_s16 = int_to_ptr.vmem [resolvable:$true] %s222_s16 }
  0x47   : > { %s1229_s10 = sshll.u32 %s308_s20, 4  ;;  %s875_s12 = sshra.s32 %s1158_s7, 4  ;;  %s876_s12 = int_to_ptr.hbm [resolvable:$true] %s875_s12  ;;  %s311_s10 = int_to_ptr.hbm [resolvable:$true] %s1229_s10 }
  0x48   : > { %p744_p0 = pneg %p1213_p9  ;;  %s882_s27 = scalar_lea.hbm %s1368_s2, 96 }
  0x49   : > { %p883_p6 = scmp.lt.s32.totalorder %s876_s12, %s1368_s2 }
  0x4a   : > { %s220_s13 = sshll.u32 %s1374_s0, 4  ;;  %p1225_p10 = pnand %p744_p0, %p1356_p11  ;;  %s221_s13 = int_to_ptr.hbm [resolvable:$true] %s220_s13 }
  0x4b   : > { %s877_s0 = scalar_lea.hbm %s876_s12, 32 }
  0x4c   : > { %p878_p12 = scmp.ne.s32.totalorder %s876_s12, %s877_s0  ;;  %p884_p0 = scmp.lt.s32.totalorder %s882_s27, %s877_s0 }
  0x4e   : > { %p880_p13 = pnand %p878_p12, %p819_p7  ;;  %p885_p8 = por %p884_p0, %p883_p6 }
  0x50   : > { %p881_p1 = pneg %p880_p13 }
  0x52   : > { %p886_p11 = pnand %p885_p8, %p881_p1 }
  0x54   : > { %889 = shalt.err (!%p886_p11)
}
  0x55   : > { %s1377_s20 = smov 8   ;;  %s1378_s25 = smov 128  }
  0x56   : > { %754 = dma.hbm_to_vmem [thread:$0]  (!%p1129_p5), %s1158_s7, 512, %s1152_s18, %s1136_s19, %s1378_s25, %s1378_s25, %s1377_s20  }
  0x57   : > { %747 = dma.hbm_to_vmem [thread:$0]  (!%p1225_p10), %s221_s13, 128, %s223_s16, [#allocation4]  }
  0x58   : > { %s305_s0 = scalar_lea.vmem [#allocation11], %s1120_s30  ;;  %s935_s23 = sshra.s32 %s311_s10, 4  ;;  %s936_s23 = int_to_ptr.hbm [resolvable:$true] %s935_s23 }
  0x59   : > { %s312_s3 = sshll.u32 %s305_s0, 4  ;;  %s937_s12 = scalar_lea.hbm %s936_s23, 1  ;;  %s313_s3 = int_to_ptr.vmem [resolvable:$true] %s312_s3 }
  0x5a   : > { %p938_p11 = scmp.ne.s32.totalorder %s936_s23, %s937_s12  ;;  %s942_s28 = scalar_lea.hbm %s1350_s5, 3 }
  0x5b   : > { %p943_p13 = scmp.lt.s32.totalorder %s936_s23, %s1350_s5  ;;  %p944_p10 = scmp.lt.s32.totalorder %s942_s28, %s937_s12 }
  0x5c   : > { %p940_p8 = pnand %p938_p11, %p819_p7 }
  0x5d   : > { %p945_p1 = por %p944_p10, %p943_p13 }
  0x5e   : > { %p941_p12 = pneg %p940_p8 }
  0x60   : > { %p946_p6 = pnand %p945_p1, %p941_p12 }
  0x62   : > { %949 = shalt.err (!%p946_p6)
}
  0x63   : > { %760 = dma.hbm_to_vmem [thread:$0]  (!%p1129_p5), %s311_s10, 16, %s313_s3, %s1165_s14  }
  0x64   : > { %321 = sbr.rel (%p1213_p9) target bundleno = 736 (0x2e0), region = 44  ;;  %p1379_p7 = scmp.eq.s32.totalorder (!%p1213_p9), %s1183_s1, 0 }
  0x69   : > { %1010 = dma.done.wait (%p1379_p7), [#allocation4], 128   ;;  %p1380_p0 = pmov %p1379_p7 }
  0x6a   : > { %s328_s2 = sand.u32 1, %s1183_s1   ;;  %s1273_s30 = sand.u32 1, %s1031_s22  }
  0x6b   : > { %1012 = vsyncadd (%p1380_p0), [#allocation4], 4294967168  ;;  %s715_s18 = sshll.u32 %s1273_s30, 3  ;;  %s329_s15 = scalar_lea.sflag [#allocation7], %s328_s2 }
  0x6c   : > { %s1276_s19 = scalar_lea.vmem [#allocation6], %s715_s18 }
  0x6d   : > { %1014 = dma.done.wait (%p1193_p2), %s329_s15, 640  }
  0x6e   : > { %1016 = vsyncadd (%p1193_p2), %s329_s15, 4294966656  ;;  %s716_s7 = sshll.u32 %s1273_s30, 5  ;;  %s349_s26 = scalar_lea.sflag [#allocation10], %s328_s2 }
  0x6f   : > { %s342_s14 = scalar_lea.vmem [#allocation8], %s716_s7  ;;  %s352_s13 = scalar_lea.vmem [#allocation9], %s716_s7 }
  0x70   : > { %1018 = dma.done.wait (%p1193_p2), %s349_s26, 528  }
  0x71   : > { %1020 = vsyncadd (%p1193_p2), %s349_s26, 4294966768  ;;  %p408_p5 = scmp.lt.s32.totalorder %s1183_s1, 2  ;;  %s361_s0 = scalar_lea.vmem [#allocation11], %s1273_s30 }
  0x72   : > { %s1296_s3 = scalar_lea.vmem [#allocation12], %s715_s18  ;;  %p1381_p9 = scmp.ne.s32.totalorder %s1183_s1, 0 }
  0x73   : > { %s1289_s17 = scalar_select %p408_p5, %s1183_s1, 2 }
  0x74   : > { %414 = sbr.rel (%p1381_p9) target bundleno = 123 (0x7b), region = 68 }
  0x75   : > { %s410_s20 = scalar_lea.vmem %s1349_s4, %s1289_s17 }
  0x79   : > { %v415_v0 = vld [vmem:[#allocation3] sm:$0xff]  ;;  %vm416_vm0 = vcmask 261120  }
  0x7a   : > { %417 = vst.msk [vmem:[#allocation2] sm:$0xff] %vm416_vm0, %v415_v0 }
  0x7b PF: > { %v423_v1 = vld [vmem:[%s342_s14 + $0x18] sm:$0xff]  ;;  %v422_v3 = vld [vmem:[%s342_s14 + $0x10] sm:$0xff]  ;;  %v421_v5 = vld [vmem:[%s342_s14 + $0x8] sm:$0xff]  ;;  %vm428_vm1 = vcmask 261120   ;;  %s1044_s8 = smov 64   ;;  %s1045_s11 = smov 96  }
  0x7c   : > { %v455_v2 = vld [vmem:[%s352_s13 + $0x18] sm:$0xff]  ;;  %444 = vmatpush.msra.mxu0 %v423_v1  ;;  %v454_v4 = vld [vmem:[%s352_s13 + $0x10] sm:$0xff]  ;;  %v453_v6 = vld [vmem:[%s352_s13 + $0x8] sm:$0xff]  ;;  %s1046_s27 = smov 32   ;;  %p723_p2 = scmp.ge.s32.totalorder %s1183_s1, 2 }
  0x7d   : > { %475 = vmatpush.msra.mxu1 %v455_v2  ;;  %v420_v7 = vld [vmem:[%s342_s14] sm:$0xff]  ;;  %v419_v10 = vld [vmem:[%s1276_s19] sm:$0xff] }
  0x7e   : > { %445 = vmatpush.msra.mxu0 %v422_v3  ;;  %v452_v8 = vld [vmem:[%s352_s13] sm:$0xff] }
  0x7f   : > { %476 = vmatpush.msra.mxu1 %v454_v4  ;;  %v808_v11 = vld [vmem:[%s361_s0] ss:$0 sm:$0xff] }
  0x80   : > { %446 = vmatpush.msra.mxu0 %v421_v5  ;;  %v807_v14 = vld [vmem:[%s410_s20] ss:$0 sm:$0xff] }
  0x81   : > { %477 = vmatpush.msra.mxu1 %v453_v6  ;;  %v418_v9 = vld [vmem:[#allocation2] sm:$0xff] }
  0x82   : > { %447 = vmatpush.msra.mxu0 %v420_v7 }
  0x83   : > { %478 = vmatpush.msra.mxu1 %v452_v8  ;;  %720 = vmatmul.msk.f32.vlgmr.msra.gmra.mxu0 %vm428_vm1, %v418_v9 }
  0x84   : > { %721 = vmatmul.msk.f32.vlgmr.msra.gmra.mxu1 %vm428_vm1, %v419_v10 }
 0x100   : > { %v449_v15 = vpop.f32.mrf.mxu0 }
 0x101   : > { %v480_v12 = vpop.f32.mrf.mxu1  ;;  %v450_v16 = vadd.f32 %v807_v14, %v449_v15 }
 0x102   : > { %v481_v13 = vadd.f32 %v808_v11, %v480_v12 }
 0x104   : > { %504 = vrot.lane.b32.xlu0 %v481_v13, %s1044_s8  ;;  %v483_v17 = vadd.f32 %v481_v13, %v450_v16 }
 0x106   : > { %v722_v18 = vmul.f32 -1.442695, %v483_v17 }
 0x108   : > { %809 = vpow2.f32 %v722_v18 }
 0x10e   : > { %v810_v19 = vpop.eup %809 }
 0x10f   : > { %v487_v20 = vadd.f32 1.0, %v810_v19 }
 0x111   : > { %811 = vrcp.f32 %v487_v20  ;;  %v499_v26 = vand.u32 2147483648, %v487_v20  ;;  %vm493_vm3 = vweird.f32 %v487_v20  ;;  %v497_v27 = vand.u32 2147483647, %v487_v20 }
 0x113   : > { %v500_v29 = vor.u32 1.1754944e-38, %v499_v26  ;;  %vm498_vm5 = vcmp.eq.f32.partialorder %v497_v27, 8.507059e+37 }
 0x117   : > { %v812_v21 = vpop.eup %811 }
 0x118   : > { %v489_v22 = vmul.f32 %v812_v21, %v487_v20  ;;  %vm494_vm2 = vweird.f32 %v812_v21 }
 0x119   : > { %vm495_vm4 = vmor %vm493_vm3, %vm494_vm2 }
 0x11a   : > { %v490_v23 = vsub.f32 1.0, %v489_v22 }
 0x11c   : > { %v491_v24 = vmul.f32 %v812_v21, %v490_v23 }
 0x11e   : > { %v492_v25 = vadd.f32 %v812_v21, %v491_v24 }
 0x120   : > { %v496_v28 = vsel %vm495_vm4, %v812_v21, %v492_v25 }
 0x121   : > { %v501_v31 = vsel %vm498_vm5, %v500_v29, %v496_v28 }
 0x122   : > { %v514_v37 = vsub.f32 1.0, %v501_v31 }
 0x176   : > { %v505_v30 = vpop.permute.xlu0 %504 }
 0x177   : > { %v507_v32 = vmul.f32 %v505_v30, %v501_v31 }
 0x179   : > { %509 = vrot.lane.b32.xlu0 %v507_v32, %s1044_s8 }
 0x1eb   : > { %v510_v33 = vpop.permute.xlu0 %509 }
 0x1ec   : > { %v512_v34 = vadd.f32 %v510_v33, %v450_v16 }
 0x1ee   : > { %813 = vtanh.f32 %v512_v34 }
 0x1f4   : > { %v814_v35 = vpop.eup %813 }
 0x1f5   : > { %516 = vrot.lane.b32.xlu1 %v814_v35, %s1045_s11 }
 0x1fd   : > { %520 = vrot.lane.b32.xlu1 %v419_v10, %s1046_s27 }
 0x267   : > { %v517_v36 = vpop.permute.xlu1 %516 }
 0x268   : > { %v519_v39 = vmul.f32 %v517_v36, %v514_v37 }
 0x26f   : > { %v521_v38 = vpop.permute.xlu1 %520 }
 0x270   : > { %v523_v40 = vmul.f32 %v521_v38, %v501_v31 }
 0x272   : > { %v524_v41 = vadd.f32 %v523_v40, %v519_v39 }
 0x274   : > { %526 = vrot.lane.b32.xlu2 %v524_v41, %s1045_s11 }
 0x2cb   : > { %533 = sbr.rel (%p723_p2) target bundleno = 721 (0x2d1), region = 72 }
 0x2ce   : > { %v527_v42 = vpop.permute.xlu2 %526 }
 0x2cf   : > { %529 = vst.msk [vmem:[%s1296_s3] sm:$0xff] %vm428_vm1, %v527_v42 }
 0x2d0   : > { %534 = vst.msk [vmem:[#allocation2] sm:$0xff] %vm428_vm1, %v527_v42 }
 0x2d1 PF: > { %s725_s28 = sshll.u32 %s1183_s1, 3  ;;  %s548_s15 = sshll.u32 %s1296_s3, 4  ;;  %s549_s15 = int_to_ptr.vmem [resolvable:$true] %s548_s15 }
 0x2d2   : > { %s546_s18 = scalar_lea.hbm %s1351_s6, %s725_s28  ;;  %s536_s7 = scalar_lea.sflag [#allocation5], %s1273_s30 }
 0x2d3   : > { %s550_s19 = sshll.u32 %s546_s18, 4  ;;  %s985_s1 = scalar_lea.hbm %s1351_s6, 24  ;;  %s551_s19 = int_to_ptr.hbm [resolvable:$true] %s550_s19 }
 0x2d4   : > { %s979_s14 = sshra.s32 %s551_s19, 4  ;;  %s980_s14 = int_to_ptr.hbm [resolvable:$true] %s979_s14 }
 0x2d5   : > { %s981_s26 = scalar_lea.hbm %s980_s14, 8  ;;  %p986_p13 = scmp.lt.s32.totalorder %s980_s14, %s1351_s6 }
 0x2d6   : > { %p982_p11 = scmp.ne.s32.totalorder %s980_s14, %s981_s26  ;;  %p987_p10 = scmp.lt.s32.totalorder %s985_s1, %s981_s26 }
 0x2d8   : > { %p983_p8 = pnand %p982_p11, %p1200_p3  ;;  %p988_p1 = por %p987_p10, %p986_p13 }
 0x2da   : > { %p984_p12 = pneg %p983_p8 }
 0x2dc   : > { %p989_p6 = pnand %p988_p1, %p984_p12 }
 0x2de   : > { %992 = shalt.err (!%p989_p6)
}
 0x2df   : > { %742 = dma.vmem_to_hbm [thread:$0]  (%p1200_p3), %s549_s15, 128, %s551_s19, %s536_s7  }
 0x2e0 PF: > { %p768_p7 = scmp.ge.s32.totalorder %s1039_s24, 2  ;;  %s562_s30 = sand.u32 1, %s1027_s21  }
 0x2e1   : > { %s563_s20 = scalar_lea.sflag [#allocation5], %s562_s30 }
 0x2e2   : > { %p762_p0 = pnand %p768_p7, %p1204_p4 }
 0x2e4   : > { %p763_p5 = pneg %p762_p0 }
 0x2e6   : > { %1022 = dma.done.wait (%p763_p5), %s563_s20, 128  }
 0x2e7   : > { %1024 = vsyncadd (%p763_p5), %s563_s20, 4294967168  ;;  %s1382_s24 = sld [smem:[#allocation18_spill]]  ;;  %s1385_s21 = smov %s1031_s22 }
 0x2e8   : > { %s1383_s0 = sld [smem:[#allocation17_spill]] }
 0x2e9   : > { %s1384_s23 = sld [smem:[#allocation19_spill]] }
 0x2ed   : > { %p23_p9 = scmp.ge.s32.totalorder %s1382_s24, 5  }
 0x2ee   : > { %s1386_s22 = smov %s1383_s0 }
 0x2ef   :  { %25 = sbr.rel (!%p23_p9) target bundleno = 13 (0xd), region = 140 }
 0x2f4   :  { %569 = vsyncpa [#allocation4], 1 }
 0x2f5   :  { %571 = vsyncpa [#allocation4 + $0x1], 1 }
 0x2f6   :  { %572 = vsyncpa [#allocation7], 1 }
 0x2f7   :  { %574 = vsyncpa [#allocation7 + $0x1], 1 }
 0x2f8   :  { %575 = vsyncpa [#allocation10], 1 }
 0x2f9   :  { %577 = vsyncpa [#allocation10 + $0x1], 1 }
 0x2fa   :  { %578 = vsyncpa [#allocation5], 1 }
 0x2fb   :  { %580 = vsyncpa [#allocation5 + $0x1], 1 }

</bundles_post_ra>
